<compile_context>
chip_gen: v6e
topology: v6e:2x2x1
jax: 0.10.0
libtpu: 0.0.40
codegen_flags: <defaults>
</compile_context>

<pallas_src>
import functools
import jax
import jax.numpy as jnp
from jax.experimental import pallas as pl
from jax.experimental.pallas import tpu as pltpu


# --------------------------------------------------------------------------- #
# Kernels
# --------------------------------------------------------------------------- #
def _head_kernel_conditioned(x_ref, w1_ref, b1_ref, w2_ref, b2_ref,
                             wh_ref, bh_ref, mu_ref, sigma_ref,
                             *, bound_tanh: bool, m_pad: int):
    """Fused MLP(2) + [mu | log_sigma] head; sigma = exp(clamp(log_sigma))."""
    cdt = w1_ref.dtype                      # bf16 compute dtype for MXU inputs
    x = x_ref[...].astype(cdt)
    h = jnp.dot(x, w1_ref[...], preferred_element_type=jnp.float32) + b1_ref[...]
    h = jnp.maximum(h, 0.0)                                            # f32 VPU
    h = jnp.dot(h.astype(cdt), w2_ref[...],
                preferred_element_type=jnp.float32) + b2_ref[...]
    h = jnp.maximum(h, 0.0)
    # Single fused head matmul: columns [0, m_pad) -> mu, [m_pad, 2*m_pad) -> log_sigma
    head = jnp.dot(h.astype(cdt), wh_ref[...],
                   preferred_element_type=jnp.float32) + bh_ref[...]
    mu = head[:, :m_pad]
    if bound_tanh:
        mu = jnp.tanh(mu)                                              # EUP
    sigma = jnp.exp(jnp.clip(head[:, m_pad:], -20.0, 2.0))             # EUP
    mu_ref[...] = mu.astype(mu_ref.dtype)
    sigma_ref[...] = sigma.astype(sigma_ref.dtype)


def _head_kernel_broadcast_sigma(x_ref, w1_ref, b1_ref, w2_ref, b2_ref,
                                 wmu_ref, bmu_ref, srow_ref,
                                 mu_ref, sigma_ref,
                                 *, bound_tanh: bool, apply_exp: bool):
    """MLP(2) + mu head; sigma broadcast (optionally exp) from a (1, Mp) row."""
    cdt = w1_ref.dtype
    x = x_ref[...].astype(cdt)
    h = jnp.dot(x, w1_ref[...], preferred_element_type=jnp.float32) + b1_ref[...]
    h = jnp.maximum(h, 0.0)
    h = jnp.dot(h.astype(cdt), w2_ref[...],
                preferred_element_type=jnp.float32) + b2_ref[...]
    h = jnp.maximum(h, 0.0)
    mu = jnp.dot(h.astype(cdt), wmu_ref[...],
                 preferred_element_type=jnp.float32) + bmu_ref[...]
    if bound_tanh:
        mu = jnp.tanh(mu)
    srow = srow_ref[...]
    if apply_exp:
        srow = jnp.exp(srow)
    mu_ref[...] = mu.astype(mu_ref.dtype)
    sigma_ref[...] = jnp.broadcast_to(srow, mu.shape).astype(sigma_ref.dtype)


# --------------------------------------------------------------------------- #
# Wrapper
# --------------------------------------------------------------------------- #
def _round_up(n: int, m: int) -> int:
    return (n + m - 1) // m * m


def _pad2(a, rows, cols, dtype):
    a = jnp.asarray(a)
    return jnp.pad(a, ((0, rows - a.shape[0]), (0, cols - a.shape[1]))).astype(dtype)


def _vmem_budget_bytes(tb, hp, mp, n_head_cols, weight_itemsize, x_itemsize):
    weights = (2 * hp * hp + hp * n_head_cols) * weight_itemsize
    biases = (2 * hp + n_head_cols + mp) * 4
    io = tb * hp * x_itemsize + 2 * tb * mp * 4
    # Assume everything may be double-buffered by the pipeline + slack.
    return 2 * (weights + biases + io) + (2 << 20)


def reparameterization_head_forward(x, params, *, sigma_type="conditioned",
                                    bound_type=None, fixed_sigma_value=1.0,
                                    weight_dtype=jnp.bfloat16, batch_tile=512):
    """Pallas-backed forward pass. Returns dict with 'mu' and 'sigma' (both (B, M) f32)."""
    assert sigma_type in ("fixed", "independent", "conditioned")
    assert bound_type in ("tanh", None)
    bound_tanh = bound_type == "tanh"

    B, H = x.shape
    M = params["wmu"].shape[1]
    Hp = _round_up(H, 128)
    Mp = _round_up(M, 128)
    n_head_cols = 2 * Mp if sigma_type == "conditioned" else Mp

    w_itemsize = jnp.dtype(weight_dtype).itemsize
    x_itemsize = jnp.dtype(x.dtype).itemsize

    # Batch tile: multiple of 8 sublanes, shrunk until the VMEM budget fits
    # under ~48 MiB (headroom for v7x's 64 MiB VMEM).
    TB = min(_round_up(batch_tile, 8), _round_up(B, 8))
    budget_cap = 48 << 20
    while TB > 8 and _vmem_budget_bytes(TB, Hp, Mp, n_head_cols,
                                        w_itemsize, x_itemsize) > budget_cap:
        TB = max(8, _round_up(TB // 2, 8))
    Bp = _round_up(B, TB)
    grid = (Bp // TB,)

    budget = _vmem_budget_bytes(TB, Hp, Mp, n_head_cols, w_itemsize, x_itemsize)
    vmem_limit = int(min(max(budget, 16 << 20), 100 << 20))

    # Pad inputs / weights once at the wrapper level (zero padding keeps the
    # valid region of the computation exact; padded rows/cols are sliced off).
    xp = jnp.pad(x, ((0, Bp - B), (0, Hp - H)))
    w1 = _pad2(params["w1"], Hp, Hp, weight_dtype)
    b1 = _pad2(params["b1"], 1, Hp, jnp.float32)
    w2 = _pad2(params["w2"], Hp, Hp, weight_dtype)
    b2 = _pad2(params["b2"], 1, Hp, jnp.float32)
    wmu = _pad2(params["wmu"], Hp, Mp, weight_dtype)
    bmu = _pad2(params["bmu"], 1, Mp, jnp.float32)

    # BlockSpecs: x/outputs tiled over the batch grid; weights/biases resident.
    x_spec = pl.BlockSpec((TB, Hp), lambda i: (i, 0))
    out_spec = pl.BlockSpec((TB, Mp), lambda i: (i, 0))
    w_spec = pl.BlockSpec((Hp, Hp), lambda i: (0, 0))
    bvec_spec = pl.BlockSpec((1, Hp), lambda i: (0, 0))
    head_w_spec = pl.BlockSpec((Hp, n_head_cols), lambda i: (0, 0))
    head_b_spec = pl.BlockSpec((1, n_head_cols), lambda i: (0, 0))
    row_spec = pl.BlockSpec((1, Mp), lambda i: (0, 0))

    compiler_params = pltpu.CompilerParams(
        dimension_semantics=("parallel",),       # batch axis -> both TCs on v7x
        vmem_limit_bytes=vmem_limit)

    n_trans = Bp * Mp * ((1 if bound_tanh else 0) +
                         (1 if sigma_type != "fixed" else 0))
    cost = pl.CostEstimate(
        flops=2 * Bp * Hp * (2 * Hp + n_head_cols),
        transcendentals=n_trans,
        bytes_accessed=(Bp * Hp * x_itemsize
                        + (2 * Hp * Hp + Hp * n_head_cols) * w_itemsize
                        + (2 * Hp + n_head_cols) * 4
                        + 2 * Bp * Mp * 4))

    out_shapes = (jax.ShapeDtypeStruct((Bp, Mp), jnp.float32),
                  jax.ShapeDtypeStruct((Bp, Mp), jnp.float32))

    if sigma_type == "conditioned":
        # Fuse the mu and log_sigma heads into one (Hp, 2*Mp) matmul.
        ws = _pad2(params["ws"], Hp, Mp, weight_dtype)
        bs = _pad2(params["bs"], 1, Mp, jnp.float32)
        w_head = jnp.concatenate([wmu, ws], axis=1)
        b_head = jnp.concatenate([bmu, bs], axis=1)
        kernel = functools.partial(_head_kernel_conditioned,
                                   bound_tanh=bound_tanh, m_pad=Mp)
        mu_p, sigma_p = pl.pallas_call(
            kernel,
            grid=grid,
            out_shape=out_shapes,
            in_specs=[x_spec, w_spec, bvec_spec, w_spec, bvec_spec,
                      head_w_spec, head_b_spec],
            out_specs=(out_spec, out_spec),
            compiler_params=compiler_params,
            cost_estimate=cost,
        )(xp, w1, b1, w2, b2, w_head, b_head)
    else:
        if sigma_type == "fixed":
            srow = jnp.full((1, Mp), fixed_sigma_value, jnp.float32)
            apply_exp = False
        else:  # independent
            srow = _pad2(params["log_sigma_param"], 1, Mp, jnp.float32)
            apply_exp = True
        kernel = functools.partial(_head_kernel_broadcast_sigma,
                                   bound_tanh=bound_tanh, apply_exp=apply_exp)
        mu_p, sigma_p = pl.pallas_call(
            kernel,
            grid=grid,
            out_shape=out_shapes,
            in_specs=[x_spec, w_spec, bvec_spec, w_spec, bvec_spec,
                      head_w_spec, head_b_spec, row_spec],
            out_specs=(out_spec, out_spec),
            compiler_params=compiler_params,
            cost_estimate=cost,
        )(xp, w1, b1, w2, b2, wmu, bmu, srow)

    return {"mu": mu_p[:B, :M], "sigma": sigma_p[:B, :M]}


# --------------------------------------------------------------------------- #
# Pure-JAX reference (f32, mirrors the PyTorch module exactly)
# --------------------------------------------------------------------------- #
def _reference_forward(x, params, *, sigma_type, bound_type, fixed_sigma_value=1.0):
    h = jnp.maximum(x @ params["w1"] + params["b1"], 0.0)
    h = jnp.maximum(h @ params["w2"] + params["b2"], 0.0)
    mu = h @ params["wmu"] + params["bmu"]
    if bound_type == "tanh":
        mu = jnp.tanh(mu)
    if sigma_type == "fixed":
        sigma = jnp.full((1, mu.shape[1]), fixed_sigma_value, mu.dtype) + jnp.zeros_like(mu)
    elif sigma_type == "independent":
        sigma = jnp.exp(params["log_sigma_param"] + jnp.zeros_like(mu))
    else:
        sigma = jnp.exp(jnp.clip(h @ params["ws"] + params["bs"], -20.0, 2.0))
    return {"mu": mu, "sigma": sigma}


def init_params(key, hidden_size, output_size):
    """Deterministic synthetic parameter init (shapes match the PyTorch module)."""
    ks = jax.random.split(key, 8)
    s = 1.0 / jnp.sqrt(hidden_size)
    return {
        "w1": jax.random.uniform(ks[0], (hidden_size, hidden_size), jnp.float32, -s, s),
        "b1": jax.random.uniform(ks[1], (1, hidden_size), jnp.float32, -s, s),
        "w2": jax.random.uniform(ks[2], (hidden_size, hidden_size), jnp.float32, -s, s),
        "b2": jax.random.uniform(ks[3], (1, hidden_size), jnp.float32, -s, s),
        "wmu": jax.random.uniform(ks[4], (hidden_size, output_size), jnp.float32, -s, s),
        "bmu": jax.random.uniform(ks[5], (1, output_size), jnp.float32, -s, s),
        "ws": jax.random.uniform(ks[6], (hidden_size, output_size), jnp.float32, -s, s),
        "bs": jax.random.uniform(ks[7], (1, output_size), jnp.float32, -s, s),
        "log_sigma_param": jnp.linspace(-0.5, 0.5, output_size,
                                        dtype=jnp.float32).reshape(1, output_size),
    }


if __name__ == "__main__":
    key = jax.random.PRNGKey(0)

    def check(B, HIDDEN, OUT, batch_tile, atol):
        k_x, k_p = jax.random.split(jax.random.fold_in(key, B * 7919 + HIDDEN))
        x = jax.random.normal(k_x, (B, HIDDEN), jnp.float32)
        params = init_params(k_p, HIDDEN, OUT)
        ok = True
        for sigma_type, bound_type in [("conditioned", "tanh"),
                                       ("conditioned", None),
                                       ("fixed", None),
                                       ("independent", None)]:
            out = reparameterization_head_forward(
                x, params, sigma_type=sigma_type, bound_type=bound_type,
                fixed_sigma_value=1.0, batch_tile=batch_tile)
            jax.block_until_ready(out["mu"])
            jax.block_until_ready(out["sigma"])
            ref = _reference_forward(
                x, params, sigma_type=sigma_type, bound_type=bound_type,
                fixed_sigma_value=1.0)
            ok &= out["mu"].shape == (B, OUT) and out["sigma"].shape == (B, OUT)
            # bf16 weights/activations in the matmuls -> loose tolerance vs f32 ref.
            ok &= bool(jnp.allclose(out["mu"], ref["mu"], atol=atol, rtol=atol))
            ok &= bool(jnp.allclose(out["sigma"], ref["sigma"], atol=atol, rtol=atol))
        return ok

    all_ok = True
    # Small shapes matching the module docstring (B, N) embedding input.
    all_ok &= check(B=4, HIDDEN=32, OUT=32, batch_tile=512, atol=2e-2)
    # Exercise batch padding + multi-step pipelined grid.
    all_ok &= check(B=200, HIDDEN=96, OUT=24, batch_tile=64, atol=2e-2)

    print("KERNEL_OK" if all_ok else "KERNEL_MISMATCH")
</pallas_src>

<mosaic_0001>
module attributes {stable_mosaic.version = 11 : i64} {
  func.func @_head_kernel_conditioned(%arg0: i32, %arg1: memref<8x128xf32, #tpu.memory_space<vmem>>, %arg2: memref<128x128xbf16, #tpu.memory_space<vmem>>, %arg3: memref<1x128xf32, #tpu.memory_space<vmem>>, %arg4: memref<128x128xbf16, #tpu.memory_space<vmem>>, %arg5: memref<1x128xf32, #tpu.memory_space<vmem>>, %arg6: memref<128x256xbf16, #tpu.memory_space<vmem>>, %arg7: memref<1x256xf32, #tpu.memory_space<vmem>>, %arg8: memref<8x128xf32, #tpu.memory_space<vmem>>, %arg9: memref<8x128xf32, #tpu.memory_space<vmem>>) attributes {dimension_semantics = [#tpu.dimension_semantics<parallel>], iteration_bounds = array<i64: 1>, scalar_prefetch = 0 : i64, scratch_operands = 0 : i64, tpu.core_type = #tpu.core_type<tc>, window_params = [{transform_indices = @transform_0, window_bounds = array<i64: 8, 128>}, {pipeline_mode = #tpu.pipeline_mode<synchronous>, transform_indices = @transform_1, window_bounds = array<i64: 128, 128>}, {pipeline_mode = #tpu.pipeline_mode<synchronous>, transform_indices = @transform_2, window_bounds = array<i64: 1, 128>}, {pipeline_mode = #tpu.pipeline_mode<synchronous>, transform_indices = @transform_3, window_bounds = array<i64: 128, 128>}, {pipeline_mode = #tpu.pipeline_mode<synchronous>, transform_indices = @transform_4, window_bounds = array<i64: 1, 128>}, {pipeline_mode = #tpu.pipeline_mode<synchronous>, transform_indices = @transform_5, window_bounds = array<i64: 128, 256>}, {pipeline_mode = #tpu.pipeline_mode<synchronous>, transform_indices = @transform_6, window_bounds = array<i64: 1, 256>}, {transform_indices = @transform_7, window_bounds = array<i64: 8, 128>}, {transform_indices = @transform_8, window_bounds = array<i64: 8, 128>}]} {
    %c0 = arith.constant 0 : index
    %c0_0 = arith.constant 0 : index
    %0 = vector.load %arg1[%c0, %c0_0] : memref<8x128xf32, #tpu.memory_space<vmem>>, vector<8x128xf32>
    %1 = arith.truncf %0 : vector<8x128xf32> to vector<8x128xbf16>
    %c0_1 = arith.constant 0 : index
    %c0_2 = arith.constant 0 : index
    %2 = vector.load %arg2[%c0_1, %c0_2] : memref<128x128xbf16, #tpu.memory_space<vmem>>, vector<128x128xbf16>
    %cst = arith.constant dense<0.000000e+00> : vector<8x128xf32>
    %3 = tpu.matmul %1, %2, %cst {dimension_numbers = #tpu.dot_dimension_numbers<[1], [0], [0], [1], [0, 0, 1, 1], [], []>} : vector<8x128xbf16>, vector<128x128xbf16>, vector<8x128xf32> -> vector<8x128xf32>
    %c0_3 = arith.constant 0 : index
    %c0_4 = arith.constant 0 : index
    %4 = vector.load %arg3[%c0_3, %c0_4] : memref<1x128xf32, #tpu.memory_space<vmem>>, vector<1x128xf32>
    %5 = vector.broadcast %4 : vector<1x128xf32> to vector<8x128xf32>
    %6 = arith.addf %3, %5 : vector<8x128xf32>
    %cst_5 = arith.constant 0.000000e+00 : f32
    %7 = vector.broadcast %cst_5 : f32 to vector<8x128xf32>
    %8 = arith.maximumf %6, %7 : vector<8x128xf32>
    %9 = arith.truncf %8 : vector<8x128xf32> to vector<8x128xbf16>
    %c0_6 = arith.constant 0 : index
    %c0_7 = arith.constant 0 : index
    %10 = vector.load %arg4[%c0_6, %c0_7] : memref<128x128xbf16, #tpu.memory_space<vmem>>, vector<128x128xbf16>
    %cst_8 = arith.constant dense<0.000000e+00> : vector<8x128xf32>
    %11 = tpu.matmul %9, %10, %cst_8 {dimension_numbers = #tpu.dot_dimension_numbers<[1], [0], [0], [1], [0, 0, 1, 1], [], []>} : vector<8x128xbf16>, vector<128x128xbf16>, vector<8x128xf32> -> vector<8x128xf32>
    %c0_9 = arith.constant 0 : index
    %c0_10 = arith.constant 0 : index
    %12 = vector.load %arg5[%c0_9, %c0_10] : memref<1x128xf32, #tpu.memory_space<vmem>>, vector<1x128xf32>
    %13 = vector.broadcast %12 : vector<1x128xf32> to vector<8x128xf32>
    %14 = arith.addf %11, %13 : vector<8x128xf32>
    %cst_11 = arith.constant 0.000000e+00 : f32
    %15 = vector.broadcast %cst_11 : f32 to vector<8x128xf32>
    %16 = arith.maximumf %14, %15 : vector<8x128xf32>
    %17 = arith.truncf %16 : vector<8x128xf32> to vector<8x128xbf16>
    %c0_12 = arith.constant 0 : index
    %c0_13 = arith.constant 0 : index
    %18 = vector.load %arg6[%c0_12, %c0_13] : memref<128x256xbf16, #tpu.memory_space<vmem>>, vector<128x256xbf16>
    %cst_14 = arith.constant dense<0.000000e+00> : vector<8x256xf32>
    %19 = tpu.matmul %17, %18, %cst_14 {dimension_numbers = #tpu.dot_dimension_numbers<[1], [0], [0], [1], [0, 0, 1, 1], [], []>} : vector<8x128xbf16>, vector<128x256xbf16>, vector<8x256xf32> -> vector<8x256xf32>
    %c0_15 = arith.constant 0 : index
    %c0_16 = arith.constant 0 : index
    %20 = vector.load %arg7[%c0_15, %c0_16] : memref<1x256xf32, #tpu.memory_space<vmem>>, vector<1x256xf32>
    %21 = vector.broadcast %20 : vector<1x256xf32> to vector<8x256xf32>
    %22 = arith.addf %19, %21 : vector<8x256xf32>
    %23 = vector.extract_strided_slice %22 {offsets = [0, 0], sizes = [8, 128], strides = [1, 1]} : vector<8x256xf32> to vector<8x128xf32>
    %24 = math.tanh %23 : vector<8x128xf32>
    %25 = vector.extract_strided_slice %22 {offsets = [0, 128], sizes = [8, 128], strides = [1, 1]} : vector<8x256xf32> to vector<8x128xf32>
    %cst_17 = arith.constant -2.000000e+01 : f32
    %cst_18 = arith.constant 2.000000e+00 : f32
    %26 = vector.broadcast %cst_17 : f32 to vector<8x128xf32>
    %27 = arith.maximumf %26, %25 : vector<8x128xf32>
    %28 = vector.broadcast %cst_18 : f32 to vector<8x128xf32>
    %29 = arith.minimumf %28, %27 : vector<8x128xf32>
    %30 = math.exp %29 : vector<8x128xf32>
    %c0_19 = arith.constant 0 : index
    %c0_20 = arith.constant 0 : index
    %31 = vector.load %arg8[%c0_19, %c0_20] : memref<8x128xf32, #tpu.memory_space<vmem>>, vector<8x128xf32>
    tpu.vector_store %arg8[%c0_19, %c0_20], %24 {strides = array<i32>} : memref<8x128xf32, #tpu.memory_space<vmem>>, vector<8x128xf32>,
    %c0_21 = arith.constant 0 : index
    %c0_22 = arith.constant 0 : index
    %32 = vector.load %arg9[%c0_21, %c0_22] : memref<8x128xf32, #tpu.memory_space<vmem>>, vector<8x128xf32>
    tpu.vector_store %arg9[%c0_21, %c0_22], %30 {strides = array<i32>} : memref<8x128xf32, #tpu.memory_space<vmem>>, vector<8x128xf32>,
    return
  }
  func.func @transform_0(%arg0: i32) -> (i32, i32) {
    %c0_i32 = arith.constant 0 : i32
    %c0_i32_0 = arith.constant 0 : i32
    return %arg0, %c0_i32 : i32, i32
  }
  func.func @transform_1(%arg0: i32) -> (i32, i32) {
    %c0_i32 = arith.constant 0 : i32
    %c0_i32_0 = arith.constant 0 : i32
    %c0_i32_1 = arith.constant 0 : i32
    return %c0_i32, %c0_i32_0 : i32, i32
  }
  func.func @transform_2(%arg0: i32) -> (i32, i32) {
    %c0_i32 = arith.constant 0 : i32
    %c0_i32_0 = arith.constant 0 : i32
    %c0_i32_1 = arith.constant 0 : i32
    return %c0_i32, %c0_i32_0 : i32, i32
  }
  func.func @transform_3(%arg0: i32) -> (i32, i32) {
    %c0_i32 = arith.constant 0 : i32
    %c0_i32_0 = arith.constant 0 : i32
    %c0_i32_1 = arith.constant 0 : i32
    return %c0_i32, %c0_i32_0 : i32, i32
  }
  func.func @transform_4(%arg0: i32) -> (i32, i32) {
    %c0_i32 = arith.constant 0 : i32
    %c0_i32_0 = arith.constant 0 : i32
    %c0_i32_1 = arith.constant 0 : i32
    return %c0_i32, %c0_i32_0 : i32, i32
  }
  func.func @transform_5(%arg0: i32) -> (i32, i32) {
    %c0_i32 = arith.constant 0 : i32
    %c0_i32_0 = arith.constant 0 : i32
    %c0_i32_1 = arith.constant 0 : i32
    return %c0_i32, %c0_i32_0 : i32, i32
  }
  func.func @transform_6(%arg0: i32) -> (i32, i32) {
    %c0_i32 = arith.constant 0 : i32
    %c0_i32_0 = arith.constant 0 : i32
    %c0_i32_1 = arith.constant 0 : i32
    return %c0_i32, %c0_i32_0 : i32, i32
  }
  func.func @transform_7(%arg0: i32) -> (i32, i32) {
    %c0_i32 = arith.constant 0 : i32
    %c0_i32_0 = arith.constant 0 : i32
    return %arg0, %c0_i32 : i32, i32
  }
  func.func @transform_8(%arg0: i32) -> (i32, i32) {
    %c0_i32 = arith.constant 0 : i32
    %c0_i32_0 = arith.constant 0 : i32
    return %arg0, %c0_i32 : i32, i32
  }
}

</mosaic_0001>

<bundles_post_ra>
// kernel: tpu_custom_call.1
= control target key start
LH: loop header
LB: loop body
LE: loop exit
PB: predicated region body
PF: predicated region fallthrough
CT: control target
= control target key end

     0   :  { %14 = vsyncpa [#allocation3], 0  ;;  %s863_s0 = inlined_call_operand.hbm [shape: f32[8,128], index: 0, kind: input, shape index: {}]   ;;  %s864_s1 = inlined_call_operand.hbm [shape: bf16[128,128], index: 1, kind: input, shape index: {}]   ;;  %s865_s2 = inlined_call_operand.vmem [shape: f32[1,128], index: 2, kind: input, shape index: {}]   ;;  %s866_s3 = inlined_call_operand.hbm [shape: bf16[128,128], index: 3, kind: input, shape index: {}]   ;;  %s867_s4 = inlined_call_operand.vmem [shape: f32[1,128], index: 4, kind: input, shape index: {}]   ;;  %s868_s5 = inlined_call_operand.hbm [shape: bf16[128,256], index: 5, kind: input, shape index: {}]   ;;  %s869_s6 = inlined_call_operand.vmem [shape: f32[1,256], index: 6, kind: input, shape index: {}]   ;;  %s870_s7 = inlined_call_operand.hbm [shape: f32[8,128], index: 7, kind: output, shape index: {0}]   ;;  %s871_s8 = inlined_call_operand.hbm [shape: f32[8,128], index: 8, kind: output, shape index: {1}]  }
   0x1   :  { %15 = vsyncpa [#allocation6], 0 }
   0x2   :  { %16 = vsyncpa [#allocation9], 0 }
   0x3   :  { %17 = vsyncpa [#allocation4], 0 }
   0x4   :  { %18 = vsyncpa [#allocation12], 0  ;;  %s778_s27 = smov [#allocation5]  }
   0x5   :  { %s34_s28 = sshll.u32 %s778_s27, 4  ;;  %s35_s28 = int_to_ptr.vmem [resolvable:$true] %s34_s28 }
   0x6   :  { %s656_s29 = scalar_lea.vmem %s35_s28, 1024  ;;  %p661_p1 = scmp.lt.s32.totalorder %s35_s28, %s35_s28 }
   0x7   :  { %p657_p0 = scmp.ne.s32.totalorder %s35_s28, %s656_s29  ;;  %p662_p2 = scmp.lt.s32.totalorder %s656_s29, %s656_s29 }
   0x9   :  { %p663_p3 = por %p662_p2, %p661_p1 }
   0xb   :  { %p664_p4 = pnand %p663_p3, %p657_p0 }
   0xd   :  { %667 = shalt.err (!%p664_p4)
}
   0xe   :  { %s779_s30 = smov 64   ;;  %s780_s9 = smov 4  }
   0xf   :  { %40 = dma.hbm_to_vmem [thread:$0]  %s864_s1, 1024, %s35_s28, [#allocation6], %s779_s30, %s779_s30, %s780_s9  }
  0x10   :  { %s781_s12 = smov [#allocation2]   ;;  %s782_s14 = smov [#allocation7]  }
  0x11   :  { %s25_s13 = sshll.u32 %s781_s12, 4  ;;  %s48_s15 = sshll.u32 %s782_s14, 4  ;;  %s26_s13 = int_to_ptr.vmem [resolvable:$true] %s25_s13  ;;  %s49_s15 = int_to_ptr.vmem [resolvable:$true] %s48_s15 }
  0x12   :  { %s676_s16 = scalar_lea.vmem %s26_s13, 128  ;;  %p681_p6 = scmp.lt.s32.totalorder %s26_s13, %s26_s13 }
  0x13   :  { %p677_p5 = scmp.ne.s32.totalorder %s26_s13, %s676_s16  ;;  %p682_p7 = scmp.lt.s32.totalorder %s676_s16, %s676_s16 }
  0x15   :  { %p683_p8 = por %p682_p7, %p681_p6 }
  0x17   :  { %p684_p9 = pnand %p683_p8, %p677_p5 }
  0x19   :  { %687 = shalt.err (!%p684_p9)
}
  0x1a   :  { %28 = dma.hbm_to_vmem [thread:$0]  %s863_s0, 128, %s26_s13, [#allocation3]  }
  0x1b   :  { %s696_s19 = scalar_lea.vmem %s49_s15, 1024  ;;  %p701_p11 = scmp.lt.s32.totalorder %s49_s15, %s49_s15 }
  0x1c   :  { %p697_p10 = scmp.ne.s32.totalorder %s49_s15, %s696_s19  ;;  %p702_p12 = scmp.lt.s32.totalorder %s696_s19, %s696_s19 }
  0x1e   :  { %p703_p13 = por %p702_p12, %p701_p11 }
  0x20   :  { %p704_p0 = pnand %p703_p13, %p697_p10 }
  0x22   :  { %707 = shalt.err (!%p704_p0)
}
  0x23   :  { %54 = dma.hbm_to_vmem [thread:$0]  %s866_s3, 1024, %s49_s15, [#allocation6], %s779_s30, %s779_s30, %s780_s9  }
  0x24   :  { %s783_s21 = smov [#allocation8]  }
  0x25   :  { %s62_s22 = sshll.u32 %s783_s21, 4  ;;  %s63_s22 = int_to_ptr.vmem [resolvable:$true] %s62_s22 }
  0x26   :  { %s716_s23 = scalar_lea.vmem %s63_s22, 2048  ;;  %p721_p2 = scmp.lt.s32.totalorder %s63_s22, %s63_s22 }
  0x27   :  { %p717_p1 = scmp.ne.s32.totalorder %s63_s22, %s716_s23  ;;  %p722_p3 = scmp.lt.s32.totalorder %s716_s23, %s716_s23 }
  0x29   :  { %p723_p4 = por %p722_p3, %p721_p2 }
  0x2b   :  { %p724_p5 = pnand %p723_p4, %p717_p1 }
  0x2d   :  { %727 = shalt.err (!%p724_p5)
}
  0x2e   :  { %s784_s0 = smov 128   ;;  %s785_s24 = smov 8  }
  0x2f   :  { %68 = dma.hbm_to_vmem [thread:$0]  %s868_s5, 2048, %s63_s22, [#allocation9], %s784_s0, %s784_s0, %s785_s24  }
  0x30   :  { %768 = dma.done.wait [#allocation3], 128  }
  0x31   :  { %769 = vsyncadd [#allocation3], 4294967168 }
  0x32   :  { %770 = dma.done.wait [#allocation6], 2048  }
  0x33   :  { %771 = vsyncadd [#allocation6], 4294965248 }
  0x34   :  { %772 = dma.done.wait [#allocation9], 2048  }
  0x35   :  { %773 = vsyncadd [#allocation9], 4294965248  ;;  %v786_v0 = vmov 0.0   ;;  %vm787_vm0 = vmmov 0   ;;  %v604_v1 = vld [vmem:[#allocation5 + $0x38] sm:$0xff]   ;;  %v605_v2 = vld [vmem:[#allocation5 + $0x30] sm:$0xff]   ;;  %v330_v52 = vlaneseq }
  0x36   :  { %551 = vmatprep.subr.bf16.mxu0 %v786_v0  ;;  %567 = vmatprep.mubr.msk.bf16.mxu0 %vm787_vm0, %v786_v0  ;;  %v606_v3 = vld [vmem:[#allocation5 + $0x28] sm:$0xff]   ;;  %v612_v4 = vld [vmem:[#allocation7 + $0x38] sm:$0xff]   ;;  %v607_v5 = vld [vmem:[#allocation5 + $0x20] sm:$0xff]   ;;  %v788_v43 = vmov 0  }
  0x37   :  { %571 = vmatprep.subr.bf16.mxu1 %v786_v0  ;;  %587 = vmatprep.mubr.msk.bf16.mxu1 %vm787_vm0, %v786_v0  ;;  %v613_v6 = vld [vmem:[#allocation7 + $0x30] sm:$0xff]   ;;  %v608_v7 = vld [vmem:[#allocation5 + $0x18] sm:$0xff]   ;;  %v614_v8 = vld [vmem:[#allocation7 + $0x28] sm:$0xff]   ;;  %v331_v53 = vshrl.u32 %v330_v52, 7 }
  0x38   :  { %552 = vmatpush3.bf16.msra.mxu0 %v604_v1  ;;  %572 = vmatpush3.bf16.msra.mxu1 %v612_v4  ;;  %v609_v9 = vld [vmem:[#allocation5 + $0x10] sm:$0xff]   ;;  %v615_v10 = vld [vmem:[#allocation7 + $0x20] sm:$0xff]   ;;  %v610_v11 = vld [vmem:[#allocation5 + $0x8] sm:$0xff]  }
  0x39   :  { %553 = vmatprep.subr.bf16.mxu0 %v786_v0  ;;  %573 = vmatprep.subr.bf16.mxu1 %v786_v0  ;;  %v616_v12 = vld [vmem:[#allocation7 + $0x18] sm:$0xff]   ;;  %v611_v13 = vld [vmem:[#allocation5] sm:$0xff]   ;;  %v617_v15 = vld [vmem:[#allocation7 + $0x10] sm:$0xff]   ;;  %v332_v54 = vsub.s32 0, %v331_v53  ;;  %v336_v56 = vsub.s32 1, %v331_v53 }
  0x3a   :  { %v84_v14 = vld [vmem:[#allocation2] sm:$0xff]  ;;  %v618_v17 = vld [vmem:[#allocation7 + $0x8] sm:$0xff]   ;;  %v619_v18 = vld [vmem:[#allocation7] sm:$0xff]  }
  0x3b   :  { %v85_v16 = vpack.c.bf16 %v84_v14, %v84_v14  ;;  %v620_v19 = vld [vmem:[#allocation8 + $0x70] ss:$8 sps:$4 sm:$0xff]   ;;  %v622_v20 = vld [vmem:[#allocation8 + $0x74] ss:$8 sps:$4 sm:$0xff]   ;;  %v625_v21 = vld [vmem:[#allocation8 + $0x64] ss:$8 sps:$4 sm:$0xff]  }
  0x3c   :  { %554 = vmatpush3.bf16.msra.mxu0 %v605_v2  ;;  %574 = vmatpush3.bf16.msra.mxu1 %v613_v6  ;;  %v623_v22 = vld [vmem:[#allocation8 + $0x60] ss:$8 sps:$4 sm:$0xff]   ;;  %v628_v23 = vld [vmem:[#allocation8 + $0x54] ss:$8 sps:$4 sm:$0xff]   ;;  %v626_v24 = vld [vmem:[#allocation8 + $0x50] ss:$8 sps:$4 sm:$0xff]  }
  0x3d   :  { %555 = vmatprep.subr.bf16.mxu0 %v786_v0  ;;  %575 = vmatprep.subr.bf16.mxu1 %v786_v0  ;;  %v631_v25 = vld [vmem:[#allocation8 + $0x44] ss:$8 sps:$4 sm:$0xff]   ;;  %v629_v26 = vld [vmem:[#allocation8 + $0x40] ss:$8 sps:$4 sm:$0xff]   ;;  %v634_v27 = vld [vmem:[#allocation8 + $0x34] ss:$8 sps:$4 sm:$0xff]  }
  0x3e   :  { %v632_v28 = vld [vmem:[#allocation8 + $0x30] ss:$8 sps:$4 sm:$0xff]   ;;  %v637_v29 = vld [vmem:[#allocation8 + $0x24] ss:$8 sps:$4 sm:$0xff]   ;;  %v635_v30 = vld [vmem:[#allocation8 + $0x20] ss:$8 sps:$4 sm:$0xff]  }
  0x3f   :  { %v640_v31 = vld [vmem:[#allocation8 + $0x14] ss:$8 sps:$4 sm:$0xff]   ;;  %v638_v32 = vld [vmem:[#allocation8 + $0x10] ss:$8 sps:$4 sm:$0xff]   ;;  %v643_v41 = vld [vmem:[#allocation8 + $0x4] ss:$8 sps:$4 sm:$0xff]  }
  0x40   :  { %556 = vmatpush3.bf16.msra.mxu0 %v606_v3  ;;  %576 = vmatpush3.bf16.msra.mxu1 %v614_v8  ;;  %v499_v33 = vld [vmem:[%s865_s2] ss:$0 sm:$0xff]  ;;  %v641_v42 = vld [vmem:[#allocation8] ss:$8 sps:$4 sm:$0xff]  }
  0x41   :  { %557 = vmatprep.subr.bf16.mxu0 %v786_v0  ;;  %577 = vmatprep.subr.bf16.mxu1 %v786_v0  ;;  %v508_v44 = vld [vmem:[%s867_s4] ss:$0 sm:$0xff]  ;;  %s789_s4 = smov [#allocation10]  }
  0x42   :  { %v328_v55 = vld [vmem:[%s869_s6] sm:$0x3]  ;;  %s474_s30 = sshll.u32 %s789_s4, 4  ;;  %s475_s30 = int_to_ptr.vmem [resolvable:$true] %s474_s30 }
  0x43   :  { %v333_v57 = vrot.slane %v328_v55, %v332_v54  ;;  %v337_v58 = vrot.slane %v328_v55, %v336_v56  ;;  %s728_s6 = scalar_lea.vmem %s475_s30, 128  ;;  %p733_p7 = scmp.lt.s32.totalorder %s475_s30, %s475_s30 }
  0x44   :  { %558 = vmatpush3.bf16.msra.mxu0 %v607_v5  ;;  %578 = vmatpush3.bf16.msra.mxu1 %v615_v10  ;;  %p729_p6 = scmp.ne.s32.totalorder %s475_s30, %s728_s6  ;;  %p734_p8 = scmp.lt.s32.totalorder %s728_s6, %s728_s6 }
  0x45   :  { %559 = vmatprep.subr.bf16.mxu0 %v786_v0  ;;  %579 = vmatprep.subr.bf16.mxu1 %v786_v0 }
  0x46   :  { %p735_p9 = por %p734_p8, %p733_p7 }
  0x48   :  { %560 = vmatpush3.bf16.msra.mxu0 %v608_v7  ;;  %580 = vmatpush3.bf16.msra.mxu1 %v616_v12  ;;  %p736_p10 = pnand %p735_p9, %p729_p6 }
  0x49   :  { %561 = vmatprep.subr.bf16.mxu0 %v786_v0  ;;  %581 = vmatprep.subr.bf16.mxu1 %v786_v0 }
  0x4c   :  { %562 = vmatpush3.bf16.msra.mxu0 %v609_v9  ;;  %582 = vmatpush3.bf16.msra.mxu1 %v617_v15 }
  0x4d   :  { %563 = vmatprep.subr.bf16.mxu0 %v786_v0  ;;  %583 = vmatprep.subr.bf16.mxu1 %v786_v0 }
  0x50   :  { %564 = vmatpush3.bf16.msra.mxu0 %v610_v11  ;;  %584 = vmatpush3.bf16.msra.mxu1 %v618_v17 }
  0x51   :  { %565 = vmatprep.subr.bf16.mxu0 %v786_v0  ;;  %585 = vmatprep.subr.bf16.mxu1 %v786_v0 }
  0x54   :  { %566 = vmatpush3.bf16.msra.mxu0 %v611_v13  ;;  %586 = vmatpush3.bf16.msra.mxu1 %v619_v18 }
  0x55   :  { %420 = vmatprep.subr.bf16.mxu0 %v622_v20 }
  0x57   :  { %568 = vmatmul.mubr.bf16.vlgmr.msra.gmra.mxu0 %v85_v16 }
  0x58   :  { %421 = vmatpush1.bf16.msra.mxu0 %v620_v19  ;;  %452 = vmatprep.mubr.bf16.mxu0 %v788_v43 }
  0x59   :  { %422 = vmatprep.subr.bf16.mxu0 %v625_v21 }
  0x5c   :  { %423 = vmatpush1.bf16.msra.mxu0 %v623_v22 }
  0x5d   :  { %424 = vmatprep.subr.bf16.mxu0 %v628_v23 }
  0x60   :  { %425 = vmatpush1.bf16.msra.mxu0 %v626_v24 }
  0x61   :  { %426 = vmatprep.subr.bf16.mxu0 %v631_v25 }
  0x64   :  { %427 = vmatpush1.bf16.msra.mxu0 %v629_v26 }
  0x65   :  { %428 = vmatprep.subr.bf16.mxu0 %v634_v27 }
  0x68   :  { %429 = vmatpush1.bf16.msra.mxu0 %v632_v28 }
  0x69   :  { %430 = vmatprep.subr.bf16.mxu0 %v637_v29 }
  0x6c   :  { %431 = vmatpush1.bf16.msra.mxu0 %v635_v30 }
  0x6d   :  { %432 = vmatprep.subr.bf16.mxu0 %v640_v31 }
  0x70   :  { %433 = vmatpush1.bf16.msra.mxu0 %v638_v32 }
  0x71   :  { %434 = vmatprep.subr.bf16.mxu0 %v643_v41 }
  0x74   :  { %435 = vmatpush1.bf16.msra.mxu0 %v641_v42 }
 0x117   :  { %v191_v34 = vpop.f32.mrf.mxu0 }
 0x118   :  { %v192_v35 = vadd.f32 %v499_v33, %v191_v34 }
 0x119   :  { %v569_v36 = vpop.f32.mrf.mxu0 }
 0x11a   :  { %v197_v37 = vmax.f32 %v192_v35, 0.0 }
 0x11b   :  { %v194_v38 = vpop.f32.mrf.mxu0 }
 0x11c   :  { %v198_v39 = vpack.c.bf16 %v197_v37, %v197_v37 }
 0x11d   :  { %v570_v40 = vpop.f32.mrf.mxu0 }
 0x11e   :  { %588 = vmatmul.mubr.bf16.vlgmr.msra.gmra.mxu1 %v198_v39 }
 0x1de   :  { %v304_v45 = vpop.f32.mrf.mxu1 }
 0x1df   :  { %v305_v46 = vadd.f32 %v508_v44, %v304_v45 }
 0x1e0   :  { %v589_v47 = vpop.f32.mrf.mxu1 }
 0x1e1   :  { %v310_v48 = vmax.f32 %v305_v46, 0.0 }
 0x1e2   :  { %v307_v49 = vpop.f32.mrf.mxu1 }
 0x1e3   :  { %v311_v50 = vpack.c.bf16 %v310_v48, %v310_v48 }
 0x1e4   :  { %v590_v51 = vpop.f32.mrf.mxu1 }
 0x1e5   :  { %453 = vmatmul.mubr.bf16.vlgmr.msra.gmra.mxu0 %v311_v50 }
 0x2a5   :  { %v454_v59 = vpop.f32.mrf.mxu0 }
 0x2a6   :  { %v455_v60 = vadd.f32 %v454_v59, %v333_v57 }
 0x2a7   :  { %v456_v61 = vpop.f32.mrf.mxu0 }
 0x2a8   :  { %644 = vtanh.f32 %v455_v60  ;;  %v457_v62 = vadd.f32 %v456_v61, %v337_v58 }
 0x2a9   :  { %v458_v63 = vpop.f32.mrf.mxu0 }
 0x2aa   :  { %v462_v0 = vmax.f32 %v457_v62, -20.0 }
 0x2ab   :  { %v459_v1 = vpop.f32.mrf.mxu0 }
 0x2ac   :  { %v463_v2 = vmin.f32 %v462_v0, 2.0 }
 0x2ae   :  { %v464_v3 = vmul.f32 1.442695, %v463_v2 }
 0x2b0   :  { %646 = vpow2.f32 %v464_v3 }
 0x2b5   :  { %v645_v4 = vpop.eup %644 }
 0x2b6   :  { %466 = vst [vmem:[#allocation10] sm:$0xff] %v645_v4 }
 0x2b7   :  { %739 = shalt.err (!%p736_p10)
}
 0x2b8   :  { %477 = dma.vmem_to_hbm [thread:$0]  %s475_s30, 128, %s870_s7, [#allocation4]  }
 0x2b9   :  { %s790_s11 = smov [#allocation11]  }
 0x2ba   :  { %s484_s12 = sshll.u32 %s790_s11, 4  ;;  %s485_s12 = int_to_ptr.vmem [resolvable:$true] %s484_s12 }
 0x2bb   :  { %s748_s13 = scalar_lea.vmem %s485_s12, 128  ;;  %p753_p12 = scmp.lt.s32.totalorder %s485_s12, %s485_s12 }
 0x2bc   :  { %p749_p11 = scmp.ne.s32.totalorder %s485_s12, %s748_s13  ;;  %p754_p13 = scmp.lt.s32.totalorder %s748_s13, %s748_s13 }
 0x2bd   :  { %v647_v5 = vpop.eup %646 }
 0x2be   :  { %467 = vst [vmem:[#allocation11] sm:$0xff] %v647_v5  ;;  %p755_p0 = por %p754_p13, %p753_p12 }
 0x2c0   :  { %p756_p1 = pnand %p755_p0, %p749_p11 }
 0x2c2   :  { %759 = shalt.err (!%p756_p1)
}
 0x2c3   :  { %487 = dma.vmem_to_hbm [thread:$0]  %s485_s12, 128, %s871_s8, [#allocation12]  }
 0x2c4   :  { %774 = dma.done.wait [#allocation4], 128  }
 0x2c5   :  { %775 = vsyncadd [#allocation4], 4294967168 }
 0x2c6   :  { %776 = dma.done.wait [#allocation12], 128  }
 0x2c7   :  { %777 = vsyncadd [#allocation12], 4294967168 }
 0x2c8   :  { %494 = vsyncpa [#allocation3], 1 }
 0x2c9   :  { %495 = vsyncpa [#allocation6], 1 }
 0x2ca   :  { %496 = vsyncpa [#allocation9], 1 }
 0x2cb   :  { %497 = vsyncpa [#allocation4], 1 }
 0x2cc   :  { %498 = vsyncpa [#allocation12], 1 }

</bundles_post_ra>
